<compile_context>
chip_gen: v6e
topology: v6e:2x2x1
jax: 0.10.0
libtpu: 0.0.40
codegen_flags: <defaults>
</compile_context>

<pallas_src>
import math
from functools import partial

import jax
import jax.numpy as jnp
from jax.experimental import pallas as pl
from jax.experimental.pallas import tpu as pltpu

BASE_CHANNEL = 16
NUM_CLASS = 245
BATCH_MAX_LENGTH = 300
BN_EPS = 1e-5


# --------------------------------------------------------------------------------------
# Tiling helpers
# --------------------------------------------------------------------------------------
def _rnd_up(x, m):
    return ((x + m - 1) // m) * m


def _tile_m(M):
    """Row tile + padded rows for matmul M axis."""
    if M <= 64:
        tm = max(32, _rnd_up(M, 32))          # tiny-M (head / CBAM FC) path
        return tm, tm
    if M % 512 == 0 and M >= 1024:
        return 512, M
    if M % 256 == 0 and M >= 512:
        return 256, M
    return 128, _rnd_up(M, 128)


def _tile_c(Dp):
    """Column / contraction tile for a dim already padded to a multiple of 128."""
    return 256 if Dp % 256 == 0 else 128


def _row_tile(HW):
    """Row tile for the fused CBAM gating kernel (operates over H*W rows)."""
    HWp = _rnd_up(HW, 8)
    if HWp <= 1024:
        return HWp, HWp
    if HWp % 256 == 0:
        return 256, HWp
    HWp = _rnd_up(HW, 128)
    return 128, HWp


# --------------------------------------------------------------------------------------
# Pallas kernels
# --------------------------------------------------------------------------------------
def _mm_kernel(*refs, act, has_add):
    """bf16 matmul, fp32 acc; epilogue = act(acc*scale + shift) [+ addend]."""
    if has_add:
        a_ref, b_ref, s_ref, t_ref, add_ref, o_ref, acc_ref = refs
    else:
        a_ref, b_ref, s_ref, t_ref, o_ref, acc_ref = refs
        add_ref = None

    @pl.when(pl.program_id(2) == 0)
    def _():
        acc_ref[...] = jnp.zeros_like(acc_ref)

    acc_ref[...] += jnp.dot(a_ref[...], b_ref[...], preferred_element_type=jnp.float32)

    @pl.when(pl.program_id(2) == pl.num_programs(2) - 1)
    def _():
        r = acc_ref[...] * s_ref[...] + t_ref[...]
        if act == "relu":
            r = jnp.maximum(r, 0.0)
        if has_add:
            r = r + add_ref[...]
        o_ref[...] = r


def _mm_call(a_p, b_p, s_p, t_p, add_p, act, tm, tk, tn):
    Mp, Kp = a_p.shape
    Np = b_p.shape[1]
    in_specs = [
        pl.BlockSpec((tm, tk), lambda i, j, k: (i, k)),
        pl.BlockSpec((tk, tn), lambda i, j, k: (k, j)),
        pl.BlockSpec((1, tn), lambda i, j, k: (0, j)),
        pl.BlockSpec((1, tn), lambda i, j, k: (0, j)),
    ]
    args = [a_p, b_p, s_p, t_p]
    if add_p is not None:
        in_specs.append(pl.BlockSpec((tm, tn), lambda i, j, k: (i, j)))
        args.append(add_p)
    return pl.pallas_call(
        partial(_mm_kernel, act=act, has_add=add_p is not None),
        out_shape=jax.ShapeDtypeStruct((Mp, Np), jnp.float32),
        grid_spec=pltpu.PrefetchScalarGridSpec(
            num_scalar_prefetch=0,
            grid=(Mp // tm, Np // tn, Kp // tk),
            in_specs=in_specs,
            out_specs=pl.BlockSpec((tm, tn), lambda i, j, k: (i, j)),
            scratch_shapes=[pltpu.VMEM((tm, tn), jnp.float32)],
        ),
        compiler_params=pltpu.CompilerParams(
            dimension_semantics=("parallel", "parallel", "arbitrary")),
    )(*args)


@partial(jax.jit, static_argnames=("act",))
def pallas_matmul(a, b, scale, shift, act="none"):
    """act((a @ b) * scale + shift) for raw (unprepared) weights — head / CBAM FCs."""
    M, K = a.shape
    N = b.shape[1]
    tm, Mp = _tile_m(M)
    Kp, Np = _rnd_up(K, 128), _rnd_up(N, 128)
    tk, tn = _tile_c(Kp), _tile_c(Np)
    a_p = jnp.pad(a.astype(jnp.bfloat16), ((0, Mp - M), (0, Kp - K)))
    b_p = jnp.pad(b.astype(jnp.bfloat16), ((0, Kp - K), (0, Np - N)))
    s_p = jnp.pad(scale.astype(jnp.float32), (0, Np - N)).reshape(1, Np)
    t_p = jnp.pad(shift.astype(jnp.float32), (0, Np - N)).reshape(1, Np)
    out = _mm_call(a_p, b_p, s_p, t_p, None, act, tm, tk, tn)
    return out[:M, :N]


@partial(jax.jit, static_argnames=("act", "n_out"))
def matmul_prepped(a, wm, s_p, t_p, act, n_out, addend=None):
    """Matmul against a pre-padded bf16 weight (Kp, Np); optional fused addend epilogue."""
    M, K = a.shape
    Kp, Np = wm.shape
    tm, Mp = _tile_m(M)
    tk, tn = _tile_c(Kp), _tile_c(Np)
    a_p = jnp.pad(a.astype(jnp.bfloat16), ((0, Mp - M), (0, Kp - K)))
    add_p = None
    if addend is not None:
        add_p = jnp.pad(addend.astype(jnp.float32), ((0, Mp - M), (0, Np - n_out)))
    out = _mm_call(a_p, wm, s_p, t_p, add_p, act, tm, tk, tn)
    return out[:M, :n_out]


def _attn_kernel(q_ref, k_ref, v_ref, o_ref):
    """Fused NonLocal attention: softmax(q @ k^T) @ v for one (batch, query-block)."""
    q = q_ref[0]
    k = k_ref[0]
    v = v_ref[0]
    s = jax.lax.dot_general(q, k, (((1,), (1,)), ((), ())),
                            preferred_element_type=jnp.float32)
    m = jnp.max(s, axis=-1, keepdims=True)
    e = jnp.exp(s - m)
    p = e * pl.reciprocal(jnp.sum(e, axis=-1, keepdims=True), approx=True)
    o_ref[0] = jnp.dot(p.astype(jnp.bfloat16), v, preferred_element_type=jnp.float32)


@jax.jit
def pallas_attention(theta, phi, g):
    """Batched embedded-gaussian attention: (n,L,I)x(n,S,I)x(n,S,I) -> (n,L,I)."""
    n, L, inter = theta.shape
    S = phi.shape[1]
    interP = _rnd_up(inter, 128)
    tl = 128
    Lp = _rnd_up(L, tl)
    th = jnp.pad(theta.astype(jnp.bfloat16), ((0, 0), (0, Lp - L), (0, interP - inter)))
    ph = jnp.pad(phi.astype(jnp.bfloat16), ((0, 0), (0, 0), (0, interP - inter)))
    gg = jnp.pad(g.astype(jnp.bfloat16), ((0, 0), (0, 0), (0, interP - inter)))
    out = pl.pallas_call(
        _attn_kernel,
        out_shape=jax.ShapeDtypeStruct((n, Lp, interP), jnp.float32),
        grid=(n, Lp // tl),
        in_specs=[
            pl.BlockSpec((1, tl, interP), lambda b, l: (b, l, 0)),
            pl.BlockSpec((1, S, interP), lambda b, l: (b, 0, 0)),
            pl.BlockSpec((1, S, interP), lambda b, l: (b, 0, 0)),
        ],
        out_specs=pl.BlockSpec((1, tl, interP), lambda b, l: (b, l, 0)),
        compiler_params=pltpu.CompilerParams(
            dimension_semantics=("parallel", "parallel")),
    )(th, ph, gg)
    return out[:, :L, :inter]


def _cbam_gate_kernel(x_ref, p_ref, w_ref, sh_ref, id_ref, o_ref, *, relu):
    """Fused CBAM spatial attention: out = relu?( x * sigmoid(patches . w + shift) + identity )."""
    sp = jnp.sum(p_ref[0] * w_ref[...], axis=-1, keepdims=True) + sh_ref[...]
    gate = 1.0 / (1.0 + jnp.exp(-sp))
    r = x_ref[0] * gate + id_ref[0]
    if relu:
        r = jnp.maximum(r, 0.0)
    o_ref[0] = r


@partial(jax.jit, static_argnames=("relu",))
def cbam_spatial_gate(xg, patches, w, shift, identity, relu=True):
    """xg/identity: (n, HW, C); patches: (n, HW, 98); w: (1,128); shift: (1,1)."""
    n, HW, C = xg.shape
    Kc = patches.shape[-1]
    tm, HWp = _row_tile(HW)
    xg_p = jnp.pad(xg.astype(jnp.float32), ((0, 0), (0, HWp - HW), (0, 0)))
    id_p = jnp.pad(identity.astype(jnp.float32), ((0, 0), (0, HWp - HW), (0, 0)))
    p_p = jnp.pad(patches.astype(jnp.float32), ((0, 0), (0, HWp - HW), (0, 128 - Kc)))
    out = pl.pallas_call(
        partial(_cbam_gate_kernel, relu=relu),
        out_shape=jax.ShapeDtypeStruct((n, HWp, C), jnp.float32),
        grid=(n, HWp // tm),
        in_specs=[
            pl.BlockSpec((1, tm, C), lambda b, i: (b, i, 0)),
            pl.BlockSpec((1, tm, 128), lambda b, i: (b, i, 0)),
            pl.BlockSpec((1, 128), lambda b, i: (0, 0)),
            pl.BlockSpec((1, 1), lambda b, i: (0, 0)),
            pl.BlockSpec((1, tm, C), lambda b, i: (b, i, 0)),
        ],
        out_specs=pl.BlockSpec((1, tm, C), lambda b, i: (b, i, 0)),
        compiler_params=pltpu.CompilerParams(
            dimension_semantics=("parallel", "parallel")),
    )(xg_p, p_p, w, shift, id_p)
    return out[:, :HW, :]


# --------------------------------------------------------------------------------------
# JAX glue: im2col, pooling, bilinear upsample
# --------------------------------------------------------------------------------------
# TODO(synk): 3x3 convs still materialize im2col patches (an implicit-GEMM conv with per-tap
# shifted index_maps would cut activation HBM traffic further); patches are kept in bf16.
def im2col(x, kh, kw, sh, sw, ph, pw):
    n, h, w, c = x.shape
    xp = jnp.pad(x, ((0, 0), (ph, ph), (pw, pw), (0, 0)))
    oh = (h + 2 * ph - kh) // sh + 1
    ow = (w + 2 * pw - kw) // sw + 1
    cols = []
    for i in range(kh):
        for j in range(kw):
            cols.append(xp[:, i:i + sh * (oh - 1) + 1:sh, j:j + sw * (ow - 1) + 1:sw, :])
    return jnp.concatenate(cols, axis=-1), oh, ow


def conv2d(x, p, addend=None):
    """Conv (+ folded BN) (+ activation) (+ optional fused residual add) via Pallas matmul."""
    kh, kw = p["ksize"]
    sh, sw = p["stride"]
    ph, pw = p["padding"]
    patches, oh, ow = im2col(x.astype(jnp.bfloat16), kh, kw, sh, sw, ph, pw)
    n = x.shape[0]
    M = n * oh * ow
    a = patches.reshape(M, kh * kw * p["cin"])
    add2d = None if addend is None else addend.reshape(M, p["cout"])
    out = matmul_prepped(a, p["wm"], p["s"], p["t"],
                         act=p["act"], n_out=p["cout"], addend=add2d)
    return out.reshape(n, oh, ow, p["cout"])


def maxpool2x2(x):
    n, h, w, c = x.shape
    return x.reshape(n, h // 2, 2, w // 2, 2, c).max(axis=(2, 4))


def upsample_bilinear(x, out_h, out_w):
    """torch.nn.Upsample(mode='bilinear', align_corners=True) semantics."""
    n, h, w, c = x.shape

    def coords(out, inp):
        if inp == 1 or out == 1:
            z = jnp.zeros((out,), jnp.int32)
            return z, z, jnp.zeros((out,), jnp.float32)
        pos = jnp.arange(out, dtype=jnp.float32) * (inp - 1) / (out - 1)
        lo = jnp.clip(jnp.floor(pos).astype(jnp.int32), 0, inp - 2)
        return lo, lo + 1, pos - lo.astype(jnp.float32)

    hl, hh, hf = coords(out_h, h)
    wl, wh, wf = coords(out_w, w)
    xh = x[:, hl] * (1.0 - hf)[None, :, None, None] + x[:, hh] * hf[None, :, None, None]
    return xh[:, :, wl] * (1.0 - wf)[None, None, :, None] + xh[:, :, wh] * wf[None, None, :, None]


# --------------------------------------------------------------------------------------
# Deterministic parameter construction (weights pre-reshaped / pre-padded / bf16)
# --------------------------------------------------------------------------------------
class Rng:
    def __init__(self, seed):
        self._key = jax.random.PRNGKey(seed)

    def normal(self, shape, std=1.0):
        self._key, sub = jax.random.split(self._key)
        return std * jax.random.normal(sub, shape, dtype=jnp.float32)


def _pair(v):
    return (v, v) if isinstance(v, int) else tuple(v)


def make_conv(rng, cin, cout, k, stride=1, padding=0, bn=True, act="relu", w_scale=1.0):
    kh, kw = _pair(k)
    w = rng.normal((kh, kw, cin, cout), std=w_scale * math.sqrt(2.0 / (kh * kw * cin)))
    if bn:  # eval-mode BN folded (running_mean=0, running_var=1)
        gamma = 1.0 + 0.1 * rng.normal((cout,))
        beta = 0.05 * rng.normal((cout,))
        scale = gamma / math.sqrt(1.0 + BN_EPS)
        shift = beta
    else:
        scale = jnp.ones((cout,), jnp.float32)
        shift = 0.02 * rng.normal((cout,))  # conv bias
    K = kh * kw * cin
    Kp, Np = _rnd_up(K, 128), _rnd_up(cout, 128)
    wm = jnp.pad(w.reshape(K, cout).astype(jnp.bfloat16), ((0, Kp - K), (0, Np - cout)))
    s_p = jnp.pad(scale.astype(jnp.float32), (0, Np - cout)).reshape(1, Np)
    t_p = jnp.pad(shift.astype(jnp.float32), (0, Np - cout)).reshape(1, Np)
    return dict(wm=wm, s=s_p, t=t_p, ksize=(kh, kw), stride=_pair(stride),
                padding=_pair(padding), act=act, cin=cin, cout=cout)


def make_linear(rng, cin, cout):
    return dict(w=rng.normal((cin, cout), std=math.sqrt(2.0 / cin)),
                b=0.02 * rng.normal((cout,)))


def make_spatial(rng):
    """CBAM spatial-attention 7x7 conv (2->1) + folded BN, stored as a 128-lane dot vector."""
    w = rng.normal((7, 7, 2, 1), std=math.sqrt(2.0 / (7 * 7 * 2)))
    gamma = 1.0 + 0.1 * rng.normal((1,))
    beta = 0.05 * rng.normal((1,))
    scale = gamma / math.sqrt(1.0 + BN_EPS)
    wv = (w.reshape(98) * scale[0]).astype(jnp.float32)
    w_p = jnp.pad(wv, (0, 128 - 98)).reshape(1, 128)
    shift = beta.reshape(1, 1).astype(jnp.float32)
    return dict(w=w_p, shift=shift)


def make_cbam(rng, c, reduction=16):
    hidden = max(c // reduction, 1)
    return dict(fc1=make_linear(rng, c, hidden),
                fc2=make_linear(rng, hidden, c),
                spatial=make_spatial(rng))


def make_basic_block(rng, inplanes, planes, stride=1):
    down = None
    if stride != 1 or inplanes != planes:
        down = make_conv(rng, inplanes, planes, 1, stride, 0, bn=True, act="none")
    return dict(conv1=make_conv(rng, inplanes, planes, 3, stride, 1, bn=True, act="relu"),
                conv2=make_conv(rng, planes, planes, 3, 1, 1, bn=True, act="none"),
                cbam=make_cbam(rng, planes, 16),
                down=down)


def make_basic_blocks(rng, inplanes, planes, blocks, stride=1):
    layers = [make_basic_block(rng, inplanes, planes, stride)]
    for _ in range(blocks - 1):
        layers.append(make_basic_block(rng, planes, planes, 1))
    return layers


def make_nonlocal(rng, c):
    inter = c // 2
    # TODO(synk): mmcv zero-initialises conv_out; a small deterministic init is used here instead.
    return dict(g=make_conv(rng, c, inter, 1, 1, 0, bn=False, act="none"),
                theta=make_conv(rng, c, inter, 1, 1, 0, bn=False, act="none"),
                phi=make_conv(rng, c, inter, 1, 1, 0, bn=False, act="none"),
                out=make_conv(rng, inter, c, 1, 1, 0, bn=False, act="none", w_scale=0.1),
                inter=inter)


def make_params(seed=1234):
    rng = Rng(seed)
    bc = BASE_CHANNEL
    ch1, ch2, ch3, ch4, ch5 = 32 + bc, 64 + 2 * bc, 128 + 4 * bc, 256 + 8 * bc, 512 + 16 * bc
    backbone = dict(
        l0=make_conv(rng, 3, ch1, 3, 1, 1),
        l1=make_conv(rng, ch1, ch2, 3, 1, 1),
        l3=make_basic_blocks(rng, ch2, ch3, 1),
        l4=make_conv(rng, ch3, ch3, 3, 1, 1),
        l5=make_nonlocal(rng, ch3),
        l7=make_basic_blocks(rng, ch3, ch4, 4),
        l8=make_conv(rng, ch4, ch4, 3, 1, 1),
        l9=make_nonlocal(rng, ch4),
        l11=make_basic_blocks(rng, ch4, ch5, 7),
        l12=make_conv(rng, ch5, ch5, 3, 1, 1),
        l13=make_basic_blocks(rng, ch5, ch5, 5),
        l14=make_nonlocal(rng, ch5),
        l15=make_conv(rng, ch5, ch5, 2, (2, 1), 0),
        l16=make_basic_blocks(rng, ch5, ch5, 3),
        l17=make_conv(rng, ch5, ch5, 2, 1, 0),
    )
    fpn = dict(
        lat4=make_conv(rng, ch5, 512, 1, 1, 0),
        lat3=make_conv(rng, ch5, 512, 1, 1, 0),
        lat2=make_conv(rng, ch4, 512, 1, 1, 0),
        t_p5=make_conv(rng, 512, 512, 3, 1, 1),
        t_p51=make_conv(rng, 512, 512, 3, 1, 1),
        t_p4=make_conv(rng, 512, 512, 3, 1, 1),
        t_p3=make_conv(rng, 512, 512, 3, 1, 1),
    )
    nl2 = make_nonlocal(rng, 512)
    # TODO(synk): MultiHead internals assumed = (batch_max_length+1) parallel FC heads on the
    # globally-pooled feature (implemented as one matmul over the used positions only).
    head = make_linear(rng, 512, (BATCH_MAX_LENGTH + 1) * NUM_CLASS)
    return dict(backbone=backbone, fpn=fpn, nl2=nl2, head=head)


# --------------------------------------------------------------------------------------
# Forward-pass building blocks
# --------------------------------------------------------------------------------------
def cbam(x, p, identity, relu=True):
    """CBAM channel + spatial attention; residual add + optional ReLU fused into the last kernel."""
    n, h, w, c = x.shape
    avg = jnp.mean(x, axis=(1, 2))
    mx = jnp.max(x, axis=(1, 2))
    pooled = jnp.concatenate([avg, mx], axis=0)                    # (2n, c)
    hidden = p["fc1"]["w"].shape[1]
    hdn = pallas_matmul(pooled, p["fc1"]["w"],
                        jnp.ones((hidden,), jnp.float32), p["fc1"]["b"], act="relu")
    s = pallas_matmul(hdn, p["fc2"]["w"],
                      jnp.ones((c,), jnp.float32), p["fc2"]["b"], act="none")
    gate = jax.nn.sigmoid(s[:n] + s[n:])
    xg = x * gate[:, None, None, :]
    comp = jnp.concatenate([jnp.max(xg, axis=-1, keepdims=True),
                            jnp.mean(xg, axis=-1, keepdims=True)], axis=-1)
    patches, _, _ = im2col(comp, 7, 7, 1, 1, 3, 3)                 # (n,h,w,98)
    out = cbam_spatial_gate(xg.reshape(n, h * w, c),
                            patches.reshape(n, h * w, 98),
                            p["spatial"]["w"], p["spatial"]["shift"],
                            identity.reshape(n, h * w, c), relu=relu)
    return out.reshape(n, h, w, c)


def basic_block(x, p):
    out = conv2d(x, p["conv1"])
    out = conv2d(out, p["conv2"])
    identity = conv2d(x, p["down"]) if p["down"] is not None else x
    # relu(cbam(out) + identity), add+relu fused into the CBAM spatial kernel
    return cbam(out, p["cbam"], identity, relu=True)


def nonlocal2d(x, p):
    """mmcv NonLocal2d, embedded_gaussian, sub_sample=True, reduction=2."""
    n, h, w, c = x.shape
    inter = p["inter"]
    g = maxpool2x2(conv2d(x, p["g"])).reshape(n, -1, inter)        # (n, S, inter)
    theta = conv2d(x, p["theta"]).reshape(n, h * w, inter)          # (n, L, inter)
    phi = maxpool2x2(conv2d(x, p["phi"])).reshape(n, -1, inter)     # (n, S, inter)
    y = pallas_attention(theta, phi, g).reshape(n, h, w, inter)
    # conv_out with residual add fused into the matmul epilogue: x + W_out(y)
    return conv2d(y, p["out"], addend=x)


def backbone_forward(x, P):
    x = conv2d(x, P["l0"])
    x = conv2d(x, P["l1"])
    x = maxpool2x2(x)
    for b in P["l3"]:
        x = basic_block(x, b)
    x = conv2d(x, P["l4"])
    x = nonlocal2d(x, P["l5"])
    x = maxpool2x2(x)
    for b in P["l7"]:
        x = basic_block(x, b)
    x = conv2d(x, P["l8"])
    x = nonlocal2d(x, P["l9"])
    c2 = x                                                  # (n,12,48,384)
    x = maxpool2x2(x)
    for b in P["l11"]:
        x = basic_block(x, b)
    x = conv2d(x, P["l12"])
    for b in P["l13"]:
        x = basic_block(x, b)
    x = nonlocal2d(x, P["l14"])
    c3 = x                                                  # (n,6,24,768)
    x = conv2d(x, P["l15"])
    for b in P["l16"]:
        x = basic_block(x, b)
    x = conv2d(x, P["l17"])
    c4 = x                                                  # (n,2,22,768)
    return c2, c3, c4


def fpn_forward(c2, c3, c4, P):
    p5 = conv2d(c4, P["lat4"])
    # lateral conv (+relu) with the upsampled top-down path fused as the matmul addend
    p4 = conv2d(c3, P["lat3"], addend=upsample_bilinear(p5, 6, 24))
    p3 = conv2d(c2, P["lat2"], addend=upsample_bilinear(p4, 12, 48))
    p5_1 = upsample_bilinear(conv2d(p5, P["t_p5"]), 6, 24)
    p5_2 = upsample_bilinear(conv2d(p5_1, P["t_p51"]), 12, 48)
    p4_1 = upsample_bilinear(conv2d(p4, P["t_p4"]), 12, 48) + p5_2
    p3_1 = conv2d(p3, P["t_p3"], addend=p4_1)
    return p3_1                                             # (n,12,48,512)


def cstr_forward(params, x_nchw, expected):
    # layout: NCHW (PyTorch convention) -> NHWC once, NHWC throughout.
    x = jnp.transpose(x_nchw.astype(jnp.float32), (0, 2, 3, 1))
    c2, c3, c4 = backbone_forward(x, params["backbone"])
    cnn_feat = fpn_forward(c2, c3, c4, params["fpn"])
    non_local_feat = nonlocal2d(cnn_feat, params["nl2"])
    feat = jnp.mean(non_local_feat, axis=(1, 2))            # AdaptiveAvgPool2d(1) + flatten
    target_length = expected.shape[-1] - 1                  # output[:, :target_length, :]
    n_cols = target_length * NUM_CLASS
    # slice the head weight to the used positions only (equivalent to computing all 301
    # positions and slicing the logits, since each position only uses its own columns)
    w_h = params["head"]["w"][:, :n_cols]
    b_h = params["head"]["b"][:n_cols]
    logits = pallas_matmul(feat, w_h, jnp.ones((n_cols,), jnp.float32), b_h, act="none")
    return logits.reshape(x.shape[0], target_length, NUM_CLASS)


# --------------------------------------------------------------------------------------
if __name__ == "__main__":
    params = make_params(seed=1234)

    key = jax.random.PRNGKey(0)
    kx, ke = jax.random.split(key)
    # NCHW input (like the PyTorch module); 48x192 is fixed by the FPN upsample sizes.
    x = jax.random.normal(kx, (2, 3, 48, 192), dtype=jnp.float32)
    expected = jax.random.randint(ke, (2, 8), 0, NUM_CLASS, dtype=jnp.int32)

    out = cstr_forward(params, x, expected)
    out = jax.block_until_ready(out)

    assert out.shape == (2, expected.shape[-1] - 1, NUM_CLASS), out.shape
    assert bool(jnp.all(jnp.isfinite(out)))
    print("KERNEL_OK")
</pallas_src>

<mosaic_0001>
module attributes {stable_mosaic.version = 11 : i64} {
  func.func @_mm_kernel(%arg0: i32, %arg1: i32, %arg2: i32, %arg3: memref<512x128xbf16, #tpu.memory_space<vmem>>, %arg4: memref<128x128xbf16, #tpu.memory_space<vmem>>, %arg5: memref<1x128xf32, #tpu.memory_space<vmem>>, %arg6: memref<1x128xf32, #tpu.memory_space<vmem>>, %arg7: memref<512x128xf32, #tpu.memory_space<vmem>>, %arg8: memref<512x128xf32, #tpu.memory_space<vmem>>) attributes {dimension_semantics = [#tpu.dimension_semantics<parallel>, #tpu.dimension_semantics<parallel>, #tpu.dimension_semantics<arbitrary>], iteration_bounds = array<i64: 36, 1, 1>, scalar_prefetch = 0 : i64, scratch_operands = 1 : i64, tpu.core_type = #tpu.core_type<tc>, window_params = [{transform_indices = @transform_0, window_bounds = array<i64: 512, 128>}, {transform_indices = @transform_1, window_bounds = array<i64: 128, 128>}, {transform_indices = @transform_2, window_bounds = array<i64: 1, 128>}, {transform_indices = @transform_3, window_bounds = array<i64: 1, 128>}, {transform_indices = @transform_4, window_bounds = array<i64: 512, 128>}]} {
    %c0_i32 = arith.constant 0 : i32
    %0 = arith.cmpi eq, %arg2, %c0_i32 : i32
    %1 = arith.extui %0 : i1 to i32
    %c0_i32_0 = arith.constant 0 : i32
    %2 = arith.cmpi ne, %1, %c0_i32_0 : i32
    scf.if %2 {
      %cst_10 = arith.constant 0.000000e+00 : f32
      %12 = vector.broadcast %cst_10 : f32 to vector<512x128xf32>
      %c0_11 = arith.constant 0 : index
      %c0_12 = arith.constant 0 : index
      %13 = vector.load %arg8[%c0_11, %c0_12] : memref<512x128xf32, #tpu.memory_space<vmem>>, vector<512x128xf32>
      tpu.vector_store %arg8[%c0_11, %c0_12], %12 {strides = array<i32>} : memref<512x128xf32, #tpu.memory_space<vmem>>, vector<512x128xf32>,
    } else {
    }
    %c0 = arith.constant 0 : index
    %c0_1 = arith.constant 0 : index
    %3 = vector.load %arg8[%c0, %c0_1] : memref<512x128xf32, #tpu.memory_space<vmem>>, vector<512x128xf32>
    %c0_2 = arith.constant 0 : index
    %c0_3 = arith.constant 0 : index
    %4 = vector.load %arg3[%c0_2, %c0_3] : memref<512x128xbf16, #tpu.memory_space<vmem>>, vector<512x128xbf16>
    %c0_4 = arith.constant 0 : index
    %c0_5 = arith.constant 0 : index
    %5 = vector.load %arg4[%c0_4, %c0_5] : memref<128x128xbf16, #tpu.memory_space<vmem>>, vector<128x128xbf16>
    %cst = arith.constant dense<0.000000e+00> : vector<512x128xf32>
    %6 = tpu.matmul %4, %5, %cst {dimension_numbers = #tpu.dot_dimension_numbers<[1], [0], [0], [1], [0, 0, 1, 1], [], []>} : vector<512x128xbf16>, vector<128x128xbf16>, vector<512x128xf32> -> vector<512x128xf32>
    %7 = arith.addf %3, %6 : vector<512x128xf32>
    %c0_6 = arith.constant 0 : index
    %c0_7 = arith.constant 0 : index
    %8 = vector.load %arg8[%c0_6, %c0_7] : memref<512x128xf32, #tpu.memory_space<vmem>>, vector<512x128xf32>
    tpu.vector_store %arg8[%c0_6, %c0_7], %7 {strides = array<i32>} : memref<512x128xf32, #tpu.memory_space<vmem>>, vector<512x128xf32>,
    %c0_i32_8 = arith.constant 0 : i32
    %9 = arith.cmpi eq, %arg2, %c0_i32_8 : i32
    %10 = arith.extui %9 : i1 to i32
    %c0_i32_9 = arith.constant 0 : i32
    %11 = arith.cmpi ne, %10, %c0_i32_9 : i32
    scf.if %11 {
      %c0_10 = arith.constant 0 : index
      %c0_11 = arith.constant 0 : index
      %12 = vector.load %arg8[%c0_10, %c0_11] : memref<512x128xf32, #tpu.memory_space<vmem>>, vector<512x128xf32>
      %c0_12 = arith.constant 0 : index
      %c0_13 = arith.constant 0 : index
      %13 = vector.load %arg5[%c0_12, %c0_13] : memref<1x128xf32, #tpu.memory_space<vmem>>, vector<1x128xf32>
      %14 = vector.broadcast %13 : vector<1x128xf32> to vector<512x128xf32>
      %15 = arith.mulf %12, %14 : vector<512x128xf32>
      %c0_14 = arith.constant 0 : index
      %c0_15 = arith.constant 0 : index
      %16 = vector.load %arg6[%c0_14, %c0_15] : memref<1x128xf32, #tpu.memory_space<vmem>>, vector<1x128xf32>
      %17 = vector.broadcast %16 : vector<1x128xf32> to vector<512x128xf32>
      %18 = arith.addf %15, %17 : vector<512x128xf32>
      %cst_16 = arith.constant 0.000000e+00 : f32
      %19 = vector.broadcast %cst_16 : f32 to vector<512x128xf32>
      %20 = arith.maximumf %18, %19 : vector<512x128xf32>
      %c0_17 = arith.constant 0 : index
      %c0_18 = arith.constant 0 : index
      %21 = vector.load %arg7[%c0_17, %c0_18] : memref<512x128xf32, #tpu.memory_space<vmem>>, vector<512x128xf32>
      tpu.vector_store %arg7[%c0_17, %c0_18], %20 {strides = array<i32>} : memref<512x128xf32, #tpu.memory_space<vmem>>, vector<512x128xf32>,
    } else {
    }
    return
  }
  func.func @transform_0(%arg0: i32, %arg1: i32, %arg2: i32) -> (i32, i32) {
    %c0_i32 = arith.constant 0 : i32
    return %arg0, %arg2 : i32, i32
  }
  func.func @transform_1(%arg0: i32, %arg1: i32, %arg2: i32) -> (i32, i32) {
    %c0_i32 = arith.constant 0 : i32
    return %arg2, %arg1 : i32, i32
  }
  func.func @transform_2(%arg0: i32, %arg1: i32, %arg2: i32) -> (i32, i32) {
    %c0_i32 = arith.constant 0 : i32
    %c0_i32_0 = arith.constant 0 : i32
    return %c0_i32, %arg1 : i32, i32
  }
  func.func @transform_3(%arg0: i32, %arg1: i32, %arg2: i32) -> (i32, i32) {
    %c0_i32 = arith.constant 0 : i32
    %c0_i32_0 = arith.constant 0 : i32
    return %c0_i32, %arg1 : i32, i32
  }
  func.func @transform_4(%arg0: i32, %arg1: i32, %arg2: i32) -> (i32, i32) {
    %c0_i32 = arith.constant 0 : i32
    return %arg0, %arg1 : i32, i32
  }
}

</mosaic_0001>

<bundles_post_ra>
// kernel: matmul_prepped.1
= control target key start
LH: loop header
LB: loop body
LE: loop exit
PB: predicated region body
PF: predicated region fallthrough
CT: control target
= control target key end

     0   :  { %s1935_s15 = smov 0   ;;  %s1937_s16 = smov 0   ;;  %s2234_s0 = inlined_call_operand.vmem [shape: bf16[18432,128], index: 0, kind: input, shape index: {}]   ;;  %s2235_s1 = inlined_call_operand.vmem [shape: bf16[128,128], index: 1, kind: input, shape index: {}]   ;;  %s2236_s2 = inlined_call_operand.vmem [shape: f32[1,128], index: 2, kind: input, shape index: {}]   ;;  %s2237_s3 = inlined_call_operand.vmem [shape: f32[1,128], index: 3, kind: input, shape index: {}]   ;;  %s2238_s4 = inlined_call_operand.vmem [shape: f32[18432,128], index: 4, kind: output, shape index: {}]  }
   0x1   :  { %s1939_s17 = smov 0  }
   0x2 LB: > { %s33_s18 = sadd.s32 1, %s1904_s16  ;;  %p1637_p0 = scmp.ge.s32.totalorder %s1908_s17, 1  ;;  %s1908_s17 = sphi %s1939_s17, %s14_s17   ;;  %s1904_s16 = sphi %s1937_s16, %s2240_s16   ;;  %s1900_s15 = sphi %s1935_s15, %s2239_s15  }
   0x3   : > { %p35_p1 = scmp.ge.s32.totalorder %s33_s18, 36  ;;  %p221_p2 = scmp.lt.s32.totalorder %s1908_s17, 37 }
   0x5   : > { %s2242_s18 = smov (%p35_p1, %s33_s18), 0  ;;  %p222_p3 = pnand %p1637_p0, %p221_p2 }
   0x6   : > { %s1638_s21 = sshll.u32 (!%p222_p3), %s1900_s15, 6 }
   0x7   : > { %225 = sbr.rel (%p222_p3) target bundleno = 307 (0x133), region = 36  ;;  %p268_p4 = scmp.lt.s32.totalorder (!%p222_p3), %s1638_s21, 2303 }
   0xc   : > { %v1846_v0 = vld [vmem:[%s2235_s1 + $0x38] sm:$0xff]   ;;  %v1847_v1 = vld [vmem:[%s2235_s1 + $0x30] sm:$0xff]   ;;  %s2244_s21 = smov (!%p268_p4, %s1638_s21), 2303  ;;  %v1848_v2 = vld [vmem:[%s2235_s1 + $0x28] sm:$0xff]  }
   0xd   : > { %1726 = vmatprep.subr.bf16.mxu0 %v1846_v0  ;;  %1806 = vmatprep.subr.bf16.mxu1 %v1846_v0  ;;  %s1639_s26 = sshll.u32 %s2244_s21, 2  ;;  %v1849_v3 = vld [vmem:[%s2235_s1 + $0x20] sm:$0xff]   ;;  %v1850_v6 = vld [vmem:[%s2235_s1 + $0x18] sm:$0xff]   ;;  %v1851_v7 = vld [vmem:[%s2235_s1 + $0x10] sm:$0xff]   ;;  %s1641_s22 = sshll.u32 %s2244_s21, 3 }
   0xe   : > { %1727 = vmatpush3.bf16.msra.mxu0 %v1846_v0  ;;  %1814 = vmatpush3.bf16.msra.mxu1 %v1846_v0  ;;  %s1968_s29 = scalar_lea.vmem %s2234_s0, %s1639_s26  ;;  %v1852_v8 = vld [vmem:[%s2235_s1 + $0x8] sm:$0xff]   ;;  %v1853_v9 = vld [vmem:[%s2235_s1] sm:$0xff]   ;;  %s2037_s25 = scalar_lea.vmem %s2238_s4, %s1641_s22 }
   0xf   : > { %1728 = vmatprep.subr.bf16.mxu0 %v1847_v1  ;;  %1807 = vmatprep.subr.bf16.mxu1 %v1847_v1  ;;  %v1854_v4 = vld [vmem:[%s1968_s29] sm:$0xff]   ;;  %v1856_v10 = vld [vmem:[%s1968_s29 + $0x8] sm:$0xff]   ;;  %v1858_v12 = vld [vmem:[%s1968_s29 + $0x10] sm:$0xff]  }
  0x10   : > { %v1855_v5 = vld [vmem:[%s1968_s29 + $0x80] sm:$0xff]   ;;  %1742 = vmatprep.mubr.bf16.mxu0 %v1854_v4  ;;  %v1857_v11 = vld [vmem:[%s1968_s29 + $0x88] sm:$0xff]   ;;  %v1859_v13 = vld [vmem:[%s1968_s29 + $0x90] sm:$0xff]  }
  0x11   : > { %1774 = vmatprep.mubr.bf16.mxu1 %v1855_v5  ;;  %v1860_v14 = vld [vmem:[%s1968_s29 + $0x18] sm:$0xff]   ;;  %v1862_v16 = vld [vmem:[%s1968_s29 + $0x20] sm:$0xff]   ;;  %v1864_v18 = vld [vmem:[%s1968_s29 + $0x28] sm:$0xff]  }
  0x12   : > { %1729 = vmatpush3.bf16.msra.mxu0 %v1847_v1  ;;  %1815 = vmatpush3.bf16.msra.mxu1 %v1847_v1  ;;  %v1861_v15 = vld [vmem:[%s1968_s29 + $0x98] sm:$0xff]   ;;  %v1863_v17 = vld [vmem:[%s1968_s29 + $0xa0] sm:$0xff]   ;;  %v1865_v19 = vld [vmem:[%s1968_s29 + $0xa8] sm:$0xff]  }
  0x13   : > { %1730 = vmatprep.subr.bf16.mxu0 %v1848_v2  ;;  %1808 = vmatprep.subr.bf16.mxu1 %v1848_v2  ;;  %v1866_v20 = vld [vmem:[%s1968_s29 + $0x30] sm:$0xff]   ;;  %v1868_v22 = vld [vmem:[%s1968_s29 + $0x38] sm:$0xff]   ;;  %v1870_v24 = vld [vmem:[%s1968_s29 + $0x40] sm:$0xff]  }
  0x14   : > { %v1867_v21 = vld [vmem:[%s1968_s29 + $0xb0] sm:$0xff]   ;;  %v1869_v23 = vld [vmem:[%s1968_s29 + $0xb8] sm:$0xff]   ;;  %v1871_v25 = vld [vmem:[%s1968_s29 + $0xc0] sm:$0xff]  }
  0x15   : > { %v1872_v26 = vld [vmem:[%s1968_s29 + $0x48] sm:$0xff]   ;;  %v1874_v28 = vld [vmem:[%s1968_s29 + $0x50] sm:$0xff]   ;;  %v1876_v30 = vld [vmem:[%s1968_s29 + $0x58] sm:$0xff]  }
  0x16   : > { %1731 = vmatpush3.bf16.msra.mxu0 %v1848_v2  ;;  %1816 = vmatpush3.bf16.msra.mxu1 %v1848_v2  ;;  %v1873_v27 = vld [vmem:[%s1968_s29 + $0xc8] sm:$0xff]   ;;  %v1875_v29 = vld [vmem:[%s1968_s29 + $0xd0] sm:$0xff]   ;;  %v1877_v31 = vld [vmem:[%s1968_s29 + $0xd8] sm:$0xff]  }
  0x17   : > { %1732 = vmatprep.subr.bf16.mxu0 %v1849_v3  ;;  %1809 = vmatprep.subr.bf16.mxu1 %v1849_v3  ;;  %v1878_v32 = vld [vmem:[%s1968_s29 + $0x60] sm:$0xff]   ;;  %v1880_v34 = vld [vmem:[%s1968_s29 + $0x68] sm:$0xff]   ;;  %v1882_v36 = vld [vmem:[%s1968_s29 + $0x70] sm:$0xff]  }
  0x18   : > { %v1879_v33 = vld [vmem:[%s1968_s29 + $0xe0] sm:$0xff]   ;;  %v1881_v35 = vld [vmem:[%s1968_s29 + $0xe8] sm:$0xff]   ;;  %v1883_v37 = vld [vmem:[%s1968_s29 + $0xf0] sm:$0xff]  }
  0x19   : > { %v1884_v38 = vld [vmem:[%s1968_s29 + $0x78] sm:$0xff]   ;;  %v2020_v40 = vld [vmem:[%s2236_s2] ss:$0 sm:$0xff] }
  0x1a   : > { %1733 = vmatpush3.bf16.msra.mxu0 %v1849_v3  ;;  %1817 = vmatpush3.bf16.msra.mxu1 %v1849_v3  ;;  %v1885_v39 = vld [vmem:[%s1968_s29 + $0xf8] sm:$0xff]   ;;  %v2025_v42 = vld [vmem:[%s2237_s3] ss:$0 sm:$0xff] }
  0x1b   : > { %1734 = vmatprep.subr.bf16.mxu0 %v1850_v6  ;;  %1810 = vmatprep.subr.bf16.mxu1 %v1850_v6 }
  0x1e   : > { %1735 = vmatpush3.bf16.msra.mxu0 %v1850_v6  ;;  %1818 = vmatpush3.bf16.msra.mxu1 %v1850_v6 }
  0x1f   : > { %1736 = vmatprep.subr.bf16.mxu0 %v1851_v7  ;;  %1811 = vmatprep.subr.bf16.mxu1 %v1851_v7 }
  0x22   : > { %1737 = vmatpush3.bf16.msra.mxu0 %v1851_v7  ;;  %1819 = vmatpush3.bf16.msra.mxu1 %v1851_v7 }
  0x23   : > { %1738 = vmatprep.subr.bf16.mxu0 %v1852_v8  ;;  %1812 = vmatprep.subr.bf16.mxu1 %v1852_v8 }
  0x26   : > { %1739 = vmatpush3.bf16.msra.mxu0 %v1852_v8  ;;  %1820 = vmatpush3.bf16.msra.mxu1 %v1852_v8 }
  0x27   : > { %1740 = vmatprep.subr.bf16.mxu0 %v1853_v9  ;;  %1813 = vmatprep.subr.bf16.mxu1 %v1853_v9 }
  0x2a   : > { %1741 = vmatpush3.bf16.msra.mxu0 %v1853_v9  ;;  %1821 = vmatpush3.bf16.msra.mxu1 %v1853_v9 }
  0x2d   : > { %1743 = vmatmul.mubr.bf16.vlgmr.msra.gmra.mxu0 %v1856_v10  ;;  %1775 = vmatmul.mubr.bf16.vlgmr.msra.gmra.mxu1 %v1857_v11 }
  0x2e   : > { %1746 = vmatprep.mubr.bf16.mxu0 %v1858_v12  ;;  %1778 = vmatprep.mubr.bf16.mxu1 %v1859_v13 }
  0x35   : > { %1747 = vmatmul.mubr.bf16.gmra.mxu0 %v1860_v14  ;;  %1779 = vmatmul.mubr.bf16.gmra.mxu1 %v1861_v15 }
  0x36   : > { %1750 = vmatprep.mubr.bf16.mxu0 %v1862_v16  ;;  %1782 = vmatprep.mubr.bf16.mxu1 %v1863_v17 }
  0x3d   : > { %1751 = vmatmul.mubr.bf16.gmra.mxu0 %v1864_v18  ;;  %1783 = vmatmul.mubr.bf16.gmra.mxu1 %v1865_v19 }
  0x3e   : > { %1754 = vmatprep.mubr.bf16.mxu0 %v1866_v20  ;;  %1786 = vmatprep.mubr.bf16.mxu1 %v1867_v21 }
  0x45   : > { %1755 = vmatmul.mubr.bf16.gmra.mxu0 %v1868_v22  ;;  %1787 = vmatmul.mubr.bf16.gmra.mxu1 %v1869_v23 }
  0x46   : > { %1758 = vmatprep.mubr.bf16.mxu0 %v1870_v24  ;;  %1790 = vmatprep.mubr.bf16.mxu1 %v1871_v25 }
  0x4d   : > { %1759 = vmatmul.mubr.bf16.gmra.mxu0 %v1872_v26  ;;  %1791 = vmatmul.mubr.bf16.gmra.mxu1 %v1873_v27 }
  0x4e   : > { %1762 = vmatprep.mubr.bf16.mxu0 %v1874_v28  ;;  %1794 = vmatprep.mubr.bf16.mxu1 %v1875_v29 }
  0x55   : > { %1763 = vmatmul.mubr.bf16.gmra.mxu0 %v1876_v30  ;;  %1795 = vmatmul.mubr.bf16.gmra.mxu1 %v1877_v31 }
  0x56   : > { %1766 = vmatprep.mubr.bf16.mxu0 %v1878_v32  ;;  %1798 = vmatprep.mubr.bf16.mxu1 %v1879_v33 }
  0x5d   : > { %1767 = vmatmul.mubr.bf16.gmra.mxu0 %v1880_v34  ;;  %1799 = vmatmul.mubr.bf16.gmra.mxu1 %v1881_v35 }
  0x5e   : > { %1770 = vmatprep.mubr.bf16.mxu0 %v1882_v36  ;;  %1802 = vmatprep.mubr.bf16.mxu1 %v1883_v37 }
  0x65   : > { %1771 = vmatmul.mubr.bf16.gmra.mxu0 %v1884_v38  ;;  %1803 = vmatmul.mubr.bf16.gmra.mxu1 %v1885_v39 }
  0xed   : > { %v1744_v41 = vpop.f32.mrf.mxu0  ;;  %v1776_v43 = vpop.f32.mrf.mxu1 }
  0xee   : > { %v1246_v44 = vmul.f32 %v1744_v41, %v2020_v40  ;;  %v1278_v45 = vmul.f32 %v1776_v43, %v2020_v40 }
  0xef   : > { %v787_v46 = vpop.f32.mrf.mxu0  ;;  %v915_v47 = vpop.f32.mrf.mxu1 }
  0xf0   : > { %v1317_v48 = vadd.f32 %v2025_v42, %v1246_v44  ;;  %v1349_v49 = vadd.f32 %v2025_v42, %v1278_v45  ;;  %v1244_v50 = vmul.f32 %v2020_v40, %v787_v46  ;;  %v1276_v51 = vmul.f32 %v2020_v40, %v915_v47 }
  0xf1   : > { %v1745_v52 = vpop.f32.mrf.mxu0  ;;  %v1777_v53 = vpop.f32.mrf.mxu1 }
  0xf2   : > { %v1381_v54 = vmax.f32 %v1317_v48, 0.0  ;;  %v1413_v55 = vmax.f32 %v1349_v49, 0.0  ;;  %v1315_v56 = vadd.f32 %v2025_v42, %v1244_v50  ;;  %v1347_v57 = vadd.f32 %v2025_v42, %v1276_v51 }
  0xf3   : > { %v1247_v58 = vmul.f32 %v1745_v52, %v2020_v40  ;;  %v1279_v59 = vmul.f32 %v1777_v53, %v2020_v40  ;;  %v790_v60 = vpop.f32.mrf.mxu0  ;;  %v918_v61 = vpop.f32.mrf.mxu1 }
  0xf4   : > { %1445 = vst [vmem:[%s2037_s25 + $0x10] sm:$0xff] %v1381_v54  ;;  %1477 = vst [vmem:[%s2037_s25 + $0x110] sm:$0xff] %v1413_v55  ;;  %v1379_v62 = vmax.f32 %v1315_v56, 0.0  ;;  %v1411_v63 = vmax.f32 %v1347_v57, 0.0  ;;  %v1245_v0 = vmul.f32 %v2020_v40, %v790_v60  ;;  %v1277_v1 = vmul.f32 %v2020_v40, %v918_v61 }
  0xf5   : > { %v1318_v2 = vadd.f32 %v2025_v42, %v1247_v58  ;;  %v1350_v3 = vadd.f32 %v2025_v42, %v1279_v59  ;;  %v1748_v4 = vpop.f32.mrf.mxu0  ;;  %v1780_v5 = vpop.f32.mrf.mxu1 }
  0xf6   : > { %1443 = vst [vmem:[%s2037_s25] sm:$0xff] %v1379_v62  ;;  %1475 = vst [vmem:[%s2037_s25 + $0x100] sm:$0xff] %v1411_v63  ;;  %v1316_v6 = vadd.f32 %v2025_v42, %v1245_v0  ;;  %v1348_v7 = vadd.f32 %v2025_v42, %v1277_v1  ;;  %v1250_v8 = vmul.f32 %v1748_v4, %v2020_v40 }
  0xf7   : > { %v1282_v9 = vmul.f32 %v1780_v5, %v2020_v40  ;;  %v1382_v10 = vmax.f32 %v1318_v2, 0.0  ;;  %v1414_v11 = vmax.f32 %v1350_v3, 0.0  ;;  %v803_v12 = vpop.f32.mrf.mxu0  ;;  %v931_v13 = vpop.f32.mrf.mxu1 }
  0xf8   : > { %v1380_v14 = vmax.f32 %v1316_v6, 0.0  ;;  %v1412_v15 = vmax.f32 %v1348_v7, 0.0  ;;  %v1321_v16 = vadd.f32 %v2025_v42, %v1250_v8  ;;  %v1248_v18 = vmul.f32 %v2020_v40, %v803_v12 }
  0xf9   : > { %v1353_v17 = vadd.f32 %v2025_v42, %v1282_v9  ;;  %1446 = vst [vmem:[%s2037_s25 + $0x18] sm:$0xff] %v1382_v10  ;;  %1478 = vst [vmem:[%s2037_s25 + $0x118] sm:$0xff] %v1414_v11  ;;  %v1280_v19 = vmul.f32 %v2020_v40, %v931_v13  ;;  %v1749_v20 = vpop.f32.mrf.mxu0  ;;  %v1781_v21 = vpop.f32.mrf.mxu1 }
  0xfa   : > { %1444 = vst [vmem:[%s2037_s25 + $0x8] sm:$0xff] %v1380_v14  ;;  %1476 = vst [vmem:[%s2037_s25 + $0x108] sm:$0xff] %v1412_v15  ;;  %v1385_v22 = vmax.f32 %v1321_v16, 0.0  ;;  %v1251_v24 = vmul.f32 %v1749_v20, %v2020_v40  ;;  %v1283_v25 = vmul.f32 %v1781_v21, %v2020_v40  ;;  %v1319_v26 = vadd.f32 %v2025_v42, %v1248_v18 }
  0xfb   : > { %v1417_v23 = vmax.f32 %v1353_v17, 0.0  ;;  %v1351_v27 = vadd.f32 %v2025_v42, %v1280_v19  ;;  %v806_v28 = vpop.f32.mrf.mxu0  ;;  %v934_v29 = vpop.f32.mrf.mxu1 }
  0xfc   : > { %1449 = vst [vmem:[%s2037_s25 + $0x30] sm:$0xff] %v1385_v22  ;;  %v1322_v30 = vadd.f32 %v2025_v42, %v1251_v24  ;;  %v1354_v31 = vadd.f32 %v2025_v42, %v1283_v25  ;;  %v1249_v32 = vmul.f32 %v2020_v40, %v806_v28  ;;  %v1281_v33 = vmul.f32 %v2020_v40, %v934_v29 }
  0xfd   : > { %1481 = vst [vmem:[%s2037_s25 + $0x130] sm:$0xff] %v1417_v23  ;;  %v1383_v34 = vmax.f32 %v1319_v26, 0.0  ;;  %v1415_v35 = vmax.f32 %v1351_v27, 0.0  ;;  %v1752_v36 = vpop.f32.mrf.mxu0  ;;  %v1784_v37 = vpop.f32.mrf.mxu1 }
  0xfe   : > { %v1386_v38 = vmax.f32 %v1322_v30, 0.0  ;;  %v1418_v39 = vmax.f32 %v1354_v31, 0.0  ;;  %v1320_v41 = vadd.f32 %v2025_v42, %v1249_v32  ;;  %v1352_v43 = vadd.f32 %v2025_v42, %v1281_v33 }
  0xff   : > { %1447 = vst [vmem:[%s2037_s25 + $0x20] sm:$0xff] %v1383_v34  ;;  %1479 = vst [vmem:[%s2037_s25 + $0x120] sm:$0xff] %v1415_v35  ;;  %v1254_v44 = vmul.f32 %v1752_v36, %v2020_v40  ;;  %v1286_v45 = vmul.f32 %v1784_v37, %v2020_v40  ;;  %v819_v46 = vpop.f32.mrf.mxu0  ;;  %v947_v47 = vpop.f32.mrf.mxu1 }
 0x100   : > { %1450 = vst [vmem:[%s2037_s25 + $0x38] sm:$0xff] %v1386_v38  ;;  %1482 = vst [vmem:[%s2037_s25 + $0x138] sm:$0xff] %v1418_v39  ;;  %v1384_v48 = vmax.f32 %v1320_v41, 0.0  ;;  %v1416_v49 = vmax.f32 %v1352_v43, 0.0  ;;  %v1252_v50 = vmul.f32 %v2020_v40, %v819_v46  ;;  %v1284_v51 = vmul.f32 %v2020_v40, %v947_v47 }
 0x101   : > { %v1325_v52 = vadd.f32 %v2025_v42, %v1254_v44  ;;  %v1357_v53 = vadd.f32 %v2025_v42, %v1286_v45  ;;  %v1753_v54 = vpop.f32.mrf.mxu0  ;;  %v1785_v55 = vpop.f32.mrf.mxu1 }
 0x102   : > { %1448 = vst [vmem:[%s2037_s25 + $0x28] sm:$0xff] %v1384_v48  ;;  %1480 = vst [vmem:[%s2037_s25 + $0x128] sm:$0xff] %v1416_v49  ;;  %v1323_v56 = vadd.f32 %v2025_v42, %v1252_v50  ;;  %v1355_v57 = vadd.f32 %v2025_v42, %v1284_v51  ;;  %v1255_v58 = vmul.f32 %v1753_v54, %v2020_v40 }
 0x103   : > { %v1287_v59 = vmul.f32 %v1785_v55, %v2020_v40  ;;  %v1389_v60 = vmax.f32 %v1325_v52, 0.0  ;;  %v1421_v61 = vmax.f32 %v1357_v53, 0.0  ;;  %v822_v62 = vpop.f32.mrf.mxu0  ;;  %v950_v63 = vpop.f32.mrf.mxu1 }
 0x104   : > { %v1387_v0 = vmax.f32 %v1323_v56, 0.0  ;;  %v1419_v1 = vmax.f32 %v1355_v57, 0.0  ;;  %v1326_v2 = vadd.f32 %v2025_v42, %v1255_v58  ;;  %v1253_v4 = vmul.f32 %v2020_v40, %v822_v62 }
 0x105   : > { %v1358_v3 = vadd.f32 %v2025_v42, %v1287_v59  ;;  %1453 = vst [vmem:[%s2037_s25 + $0x50] sm:$0xff] %v1389_v60  ;;  %1485 = vst [vmem:[%s2037_s25 + $0x150] sm:$0xff] %v1421_v61  ;;  %v1285_v5 = vmul.f32 %v2020_v40, %v950_v63  ;;  %v1756_v6 = vpop.f32.mrf.mxu0  ;;  %v1788_v7 = vpop.f32.mrf.mxu1 }
 0x106   : > { %1451 = vst [vmem:[%s2037_s25 + $0x40] sm:$0xff] %v1387_v0  ;;  %1483 = vst [vmem:[%s2037_s25 + $0x140] sm:$0xff] %v1419_v1  ;;  %v1390_v8 = vmax.f32 %v1326_v2, 0.0  ;;  %v1258_v10 = vmul.f32 %v1756_v6, %v2020_v40  ;;  %v1290_v11 = vmul.f32 %v1788_v7, %v2020_v40  ;;  %v1324_v12 = vadd.f32 %v2025_v42, %v1253_v4 }
 0x107   : > { %v1422_v9 = vmax.f32 %v1358_v3, 0.0  ;;  %v1356_v13 = vadd.f32 %v2025_v42, %v1285_v5  ;;  %v835_v14 = vpop.f32.mrf.mxu0  ;;  %v963_v15 = vpop.f32.mrf.mxu1 }
 0x108   : > { %1454 = vst [vmem:[%s2037_s25 + $0x58] sm:$0xff] %v1390_v8  ;;  %v1329_v16 = vadd.f32 %v2025_v42, %v1258_v10  ;;  %v1361_v17 = vadd.f32 %v2025_v42, %v1290_v11  ;;  %v1256_v18 = vmul.f32 %v2020_v40, %v835_v14  ;;  %v1288_v19 = vmul.f32 %v2020_v40, %v963_v15 }
 0x109   : > { %1486 = vst [vmem:[%s2037_s25 + $0x158] sm:$0xff] %v1422_v9  ;;  %v1388_v20 = vmax.f32 %v1324_v12, 0.0  ;;  %v1420_v21 = vmax.f32 %v1356_v13, 0.0  ;;  %v1757_v22 = vpop.f32.mrf.mxu0  ;;  %v1789_v23 = vpop.f32.mrf.mxu1 }
 0x10a   : > { %v1393_v24 = vmax.f32 %v1329_v16, 0.0  ;;  %v1425_v25 = vmax.f32 %v1361_v17, 0.0  ;;  %v1327_v26 = vadd.f32 %v2025_v42, %v1256_v18  ;;  %v1359_v27 = vadd.f32 %v2025_v42, %v1288_v19 }
 0x10b   : > { %1452 = vst [vmem:[%s2037_s25 + $0x48] sm:$0xff] %v1388_v20  ;;  %1484 = vst [vmem:[%s2037_s25 + $0x148] sm:$0xff] %v1420_v21  ;;  %v1259_v28 = vmul.f32 %v1757_v22, %v2020_v40  ;;  %v1291_v29 = vmul.f32 %v1789_v23, %v2020_v40  ;;  %v838_v30 = vpop.f32.mrf.mxu0  ;;  %v966_v31 = vpop.f32.mrf.mxu1 }
 0x10c   : > { %1457 = vst [vmem:[%s2037_s25 + $0x70] sm:$0xff] %v1393_v24  ;;  %1489 = vst [vmem:[%s2037_s25 + $0x170] sm:$0xff] %v1425_v25  ;;  %v1391_v32 = vmax.f32 %v1327_v26, 0.0  ;;  %v1423_v33 = vmax.f32 %v1359_v27, 0.0  ;;  %v1257_v34 = vmul.f32 %v2020_v40, %v838_v30  ;;  %v1289_v35 = vmul.f32 %v2020_v40, %v966_v31 }
 0x10d   : > { %v1330_v36 = vadd.f32 %v2025_v42, %v1259_v28  ;;  %v1362_v37 = vadd.f32 %v2025_v42, %v1291_v29  ;;  %v1760_v38 = vpop.f32.mrf.mxu0  ;;  %v1792_v39 = vpop.f32.mrf.mxu1 }
 0x10e   : > { %1455 = vst [vmem:[%s2037_s25 + $0x60] sm:$0xff] %v1391_v32  ;;  %1487 = vst [vmem:[%s2037_s25 + $0x160] sm:$0xff] %v1423_v33  ;;  %v1328_v41 = vadd.f32 %v2025_v42, %v1257_v34  ;;  %v1360_v43 = vadd.f32 %v2025_v42, %v1289_v35  ;;  %v1262_v44 = vmul.f32 %v1760_v38, %v2020_v40 }
 0x10f   : > { %v1294_v45 = vmul.f32 %v1792_v39, %v2020_v40  ;;  %v1394_v46 = vmax.f32 %v1330_v36, 0.0  ;;  %v1426_v47 = vmax.f32 %v1362_v37, 0.0  ;;  %v851_v48 = vpop.f32.mrf.mxu0  ;;  %v979_v49 = vpop.f32.mrf.mxu1 }
 0x110   : > { %v1392_v50 = vmax.f32 %v1328_v41, 0.0  ;;  %v1424_v51 = vmax.f32 %v1360_v43, 0.0  ;;  %v1333_v52 = vadd.f32 %v2025_v42, %v1262_v44  ;;  %v1260_v54 = vmul.f32 %v2020_v40, %v851_v48 }
 0x111   : > { %v1365_v53 = vadd.f32 %v2025_v42, %v1294_v45  ;;  %1458 = vst [vmem:[%s2037_s25 + $0x78] sm:$0xff] %v1394_v46  ;;  %1490 = vst [vmem:[%s2037_s25 + $0x178] sm:$0xff] %v1426_v47  ;;  %v1292_v55 = vmul.f32 %v2020_v40, %v979_v49  ;;  %v1761_v56 = vpop.f32.mrf.mxu0  ;;  %v1793_v57 = vpop.f32.mrf.mxu1 }
 0x112   : > { %1456 = vst [vmem:[%s2037_s25 + $0x68] sm:$0xff] %v1392_v50  ;;  %1488 = vst [vmem:[%s2037_s25 + $0x168] sm:$0xff] %v1424_v51  ;;  %v1397_v58 = vmax.f32 %v1333_v52, 0.0  ;;  %v1263_v60 = vmul.f32 %v1761_v56, %v2020_v40  ;;  %v1295_v61 = vmul.f32 %v1793_v57, %v2020_v40  ;;  %v1331_v62 = vadd.f32 %v2025_v42, %v1260_v54 }
 0x113   : > { %v1429_v59 = vmax.f32 %v1365_v53, 0.0  ;;  %v1363_v63 = vadd.f32 %v2025_v42, %v1292_v55  ;;  %v854_v0 = vpop.f32.mrf.mxu0  ;;  %v982_v1 = vpop.f32.mrf.mxu1 }
 0x114   : > { %1461 = vst [vmem:[%s2037_s25 + $0x90] sm:$0xff] %v1397_v58  ;;  %v1334_v2 = vadd.f32 %v2025_v42, %v1263_v60  ;;  %v1366_v3 = vadd.f32 %v2025_v42, %v1295_v61  ;;  %v1261_v4 = vmul.f32 %v2020_v40, %v854_v0  ;;  %v1293_v5 = vmul.f32 %v2020_v40, %v982_v1 }
 0x115   : > { %1493 = vst [vmem:[%s2037_s25 + $0x190] sm:$0xff] %v1429_v59  ;;  %v1395_v6 = vmax.f32 %v1331_v62, 0.0  ;;  %v1427_v7 = vmax.f32 %v1363_v63, 0.0  ;;  %v1764_v8 = vpop.f32.mrf.mxu0  ;;  %v1796_v9 = vpop.f32.mrf.mxu1 }
 0x116   : > { %v1398_v10 = vmax.f32 %v1334_v2, 0.0  ;;  %v1430_v11 = vmax.f32 %v1366_v3, 0.0  ;;  %v1332_v12 = vadd.f32 %v2025_v42, %v1261_v4  ;;  %v1364_v13 = vadd.f32 %v2025_v42, %v1293_v5 }
 0x117   : > { %1459 = vst [vmem:[%s2037_s25 + $0x80] sm:$0xff] %v1395_v6  ;;  %1491 = vst [vmem:[%s2037_s25 + $0x180] sm:$0xff] %v1427_v7  ;;  %v1266_v14 = vmul.f32 %v1764_v8, %v2020_v40  ;;  %v1298_v15 = vmul.f32 %v1796_v9, %v2020_v40  ;;  %v867_v16 = vpop.f32.mrf.mxu0  ;;  %v995_v17 = vpop.f32.mrf.mxu1 }
 0x118   : > { %1462 = vst [vmem:[%s2037_s25 + $0x98] sm:$0xff] %v1398_v10  ;;  %1494 = vst [vmem:[%s2037_s25 + $0x198] sm:$0xff] %v1430_v11  ;;  %v1396_v18 = vmax.f32 %v1332_v12, 0.0  ;;  %v1428_v19 = vmax.f32 %v1364_v13, 0.0  ;;  %v1264_v20 = vmul.f32 %v2020_v40, %v867_v16  ;;  %v1296_v21 = vmul.f32 %v2020_v40, %v995_v17 }
 0x119   : > { %v1337_v22 = vadd.f32 %v2025_v42, %v1266_v14  ;;  %v1369_v23 = vadd.f32 %v2025_v42, %v1298_v15  ;;  %v1765_v24 = vpop.f32.mrf.mxu0  ;;  %v1797_v25 = vpop.f32.mrf.mxu1 }
 0x11a   : > { %1460 = vst [vmem:[%s2037_s25 + $0x88] sm:$0xff] %v1396_v18  ;;  %1492 = vst [vmem:[%s2037_s25 + $0x188] sm:$0xff] %v1428_v19  ;;  %v1335_v26 = vadd.f32 %v2025_v42, %v1264_v20  ;;  %v1367_v27 = vadd.f32 %v2025_v42, %v1296_v21  ;;  %v1267_v28 = vmul.f32 %v1765_v24, %v2020_v40 }
 0x11b   : > { %v1299_v29 = vmul.f32 %v1797_v25, %v2020_v40  ;;  %v1401_v30 = vmax.f32 %v1337_v22, 0.0  ;;  %v1433_v31 = vmax.f32 %v1369_v23, 0.0  ;;  %v870_v32 = vpop.f32.mrf.mxu0  ;;  %v998_v33 = vpop.f32.mrf.mxu1 }
 0x11c   : > { %v1399_v34 = vmax.f32 %v1335_v26, 0.0  ;;  %v1431_v35 = vmax.f32 %v1367_v27, 0.0  ;;  %v1338_v36 = vadd.f32 %v2025_v42, %v1267_v28  ;;  %v1265_v38 = vmul.f32 %v2020_v40, %v870_v32 }
 0x11d   : > { %v1370_v37 = vadd.f32 %v2025_v42, %v1299_v29  ;;  %1465 = vst [vmem:[%s2037_s25 + $0xb0] sm:$0xff] %v1401_v30  ;;  %1497 = vst [vmem:[%s2037_s25 + $0x1b0] sm:$0xff] %v1433_v31  ;;  %v1297_v39 = vmul.f32 %v2020_v40, %v998_v33  ;;  %v1768_v41 = vpop.f32.mrf.mxu0  ;;  %v1800_v43 = vpop.f32.mrf.mxu1 }
 0x11e   : > { %1463 = vst [vmem:[%s2037_s25 + $0xa0] sm:$0xff] %v1399_v34  ;;  %1495 = vst [vmem:[%s2037_s25 + $0x1a0] sm:$0xff] %v1431_v35  ;;  %v1402_v44 = vmax.f32 %v1338_v36, 0.0  ;;  %v1270_v46 = vmul.f32 %v1768_v41, %v2020_v40  ;;  %v1302_v47 = vmul.f32 %v1800_v43, %v2020_v40  ;;  %v1336_v48 = vadd.f32 %v2025_v42, %v1265_v38 }
 0x11f   : > { %v1434_v45 = vmax.f32 %v1370_v37, 0.0  ;;  %v1368_v49 = vadd.f32 %v2025_v42, %v1297_v39  ;;  %v883_v50 = vpop.f32.mrf.mxu0  ;;  %v1011_v51 = vpop.f32.mrf.mxu1 }
 0x120   : > { %1466 = vst [vmem:[%s2037_s25 + $0xb8] sm:$0xff] %v1402_v44  ;;  %v1341_v52 = vadd.f32 %v2025_v42, %v1270_v46  ;;  %v1373_v53 = vadd.f32 %v2025_v42, %v1302_v47  ;;  %v1268_v54 = vmul.f32 %v2020_v40, %v883_v50  ;;  %v1300_v55 = vmul.f32 %v2020_v40, %v1011_v51 }
 0x121   : > { %1498 = vst [vmem:[%s2037_s25 + $0x1b8] sm:$0xff] %v1434_v45  ;;  %v1400_v56 = vmax.f32 %v1336_v48, 0.0  ;;  %v1432_v57 = vmax.f32 %v1368_v49, 0.0  ;;  %v1769_v58 = vpop.f32.mrf.mxu0  ;;  %v1801_v59 = vpop.f32.mrf.mxu1 }
 0x122   : > { %v1405_v60 = vmax.f32 %v1341_v52, 0.0  ;;  %v1437_v61 = vmax.f32 %v1373_v53, 0.0  ;;  %v1339_v62 = vadd.f32 %v2025_v42, %v1268_v54  ;;  %v1371_v63 = vadd.f32 %v2025_v42, %v1300_v55 }
 0x123   : > { %1464 = vst [vmem:[%s2037_s25 + $0xa8] sm:$0xff] %v1400_v56  ;;  %1496 = vst [vmem:[%s2037_s25 + $0x1a8] sm:$0xff] %v1432_v57  ;;  %v1271_v0 = vmul.f32 %v1769_v58, %v2020_v40  ;;  %v1303_v1 = vmul.f32 %v1801_v59, %v2020_v40  ;;  %v886_v2 = vpop.f32.mrf.mxu0  ;;  %v1014_v3 = vpop.f32.mrf.mxu1 }
 0x124   : > { %1469 = vst [vmem:[%s2037_s25 + $0xd0] sm:$0xff] %v1405_v60  ;;  %1501 = vst [vmem:[%s2037_s25 + $0x1d0] sm:$0xff] %v1437_v61  ;;  %v1403_v4 = vmax.f32 %v1339_v62, 0.0  ;;  %v1435_v5 = vmax.f32 %v1371_v63, 0.0  ;;  %v1269_v6 = vmul.f32 %v2020_v40, %v886_v2  ;;  %v1301_v7 = vmul.f32 %v2020_v40, %v1014_v3 }
 0x125   : > { %v1342_v8 = vadd.f32 %v2025_v42, %v1271_v0  ;;  %v1374_v9 = vadd.f32 %v2025_v42, %v1303_v1  ;;  %v1772_v10 = vpop.f32.mrf.mxu0  ;;  %v1804_v11 = vpop.f32.mrf.mxu1 }
 0x126   : > { %1467 = vst [vmem:[%s2037_s25 + $0xc0] sm:$0xff] %v1403_v4  ;;  %1499 = vst [vmem:[%s2037_s25 + $0x1c0] sm:$0xff] %v1435_v5  ;;  %v1340_v12 = vadd.f32 %v2025_v42, %v1269_v6  ;;  %v1372_v13 = vadd.f32 %v2025_v42, %v1301_v7  ;;  %v1274_v14 = vmul.f32 %v1772_v10, %v2020_v40 }
 0x127   : > { %v1306_v15 = vmul.f32 %v1804_v11, %v2020_v40  ;;  %v1406_v16 = vmax.f32 %v1342_v8, 0.0  ;;  %v1438_v17 = vmax.f32 %v1374_v9, 0.0  ;;  %v899_v18 = vpop.f32.mrf.mxu0  ;;  %v1027_v19 = vpop.f32.mrf.mxu1 }
 0x128   : > { %v1404_v20 = vmax.f32 %v1340_v12, 0.0  ;;  %v1436_v21 = vmax.f32 %v1372_v13, 0.0  ;;  %v1345_v22 = vadd.f32 %v2025_v42, %v1274_v14  ;;  %v1272_v24 = vmul.f32 %v2020_v40, %v899_v18 }
 0x129   : > { %v1377_v23 = vadd.f32 %v2025_v42, %v1306_v15  ;;  %1470 = vst [vmem:[%s2037_s25 + $0xd8] sm:$0xff] %v1406_v16  ;;  %1502 = vst [vmem:[%s2037_s25 + $0x1d8] sm:$0xff] %v1438_v17  ;;  %v1304_v25 = vmul.f32 %v2020_v40, %v1027_v19  ;;  %v1773_v26 = vpop.f32.mrf.mxu0  ;;  %v1805_v27 = vpop.f32.mrf.mxu1 }
 0x12a   : > { %1468 = vst [vmem:[%s2037_s25 + $0xc8] sm:$0xff] %v1404_v20  ;;  %1500 = vst [vmem:[%s2037_s25 + $0x1c8] sm:$0xff] %v1436_v21  ;;  %v1409_v28 = vmax.f32 %v1345_v22, 0.0  ;;  %v1275_v30 = vmul.f32 %v1773_v26, %v2020_v40  ;;  %v1307_v31 = vmul.f32 %v1805_v27, %v2020_v40  ;;  %v1343_v32 = vadd.f32 %v2025_v42, %v1272_v24 }
 0x12b   : > { %v1441_v29 = vmax.f32 %v1377_v23, 0.0  ;;  %v1375_v33 = vadd.f32 %v2025_v42, %v1304_v25  ;;  %v902_v34 = vpop.f32.mrf.mxu0  ;;  %v1030_v35 = vpop.f32.mrf.mxu1 }
 0x12c   : > { %1473 = vst [vmem:[%s2037_s25 + $0xf0] sm:$0xff] %v1409_v28  ;;  %v1346_v36 = vadd.f32 %v2025_v42, %v1275_v30  ;;  %v1378_v37 = vadd.f32 %v2025_v42, %v1307_v31  ;;  %v1273_v38 = vmul.f32 %v2020_v40, %v902_v34  ;;  %v1305_v39 = vmul.f32 %v2020_v40, %v1030_v35 }
 0x12d   : > { %1505 = vst [vmem:[%s2037_s25 + $0x1f0] sm:$0xff] %v1441_v29  ;;  %v1407_v41 = vmax.f32 %v1343_v32, 0.0  ;;  %v1439_v43 = vmax.f32 %v1375_v33, 0.0 }
 0x12e   : > { %v1410_v44 = vmax.f32 %v1346_v36, 0.0  ;;  %v1442_v45 = vmax.f32 %v1378_v37, 0.0  ;;  %v1344_v46 = vadd.f32 %v2025_v42, %v1273_v38  ;;  %v1376_v47 = vadd.f32 %v2025_v42, %v1305_v39 }
 0x12f   : > { %1471 = vst [vmem:[%s2037_s25 + $0xe0] sm:$0xff] %v1407_v41  ;;  %1503 = vst [vmem:[%s2037_s25 + $0x1e0] sm:$0xff] %v1439_v43 }
 0x130   : > { %1474 = vst [vmem:[%s2037_s25 + $0xf8] sm:$0xff] %v1410_v44  ;;  %1506 = vst [vmem:[%s2037_s25 + $0x1f8] sm:$0xff] %v1442_v45  ;;  %v1408_v48 = vmax.f32 %v1344_v46, 0.0  ;;  %v1440_v49 = vmax.f32 %v1376_v47, 0.0 }
 0x132   : > { %1472 = vst [vmem:[%s2037_s25 + $0xe8] sm:$0xff] %v1408_v48  ;;  %1504 = vst [vmem:[%s2037_s25 + $0x1e8] sm:$0xff] %v1440_v49 }
 0x133 PF: > { %s14_s17 = sadd.s32 1, %s1908_s17   ;;  %s2239_s15 = smov %s1904_s16 }
 0x134   : > { %p11_p5 = scmp.ge.s32.totalorder %s14_s17, 38   ;;  %s2240_s16 = smov %s2242_s18 }
 0x136   :  { %13 = sbr.rel (!%p11_p5) target bundleno = 2 (0x2), region = 83 }

</bundles_post_ra>
